<compile_context>
chip_gen: v7x
topology: tpu7x:2x2x1
jax: 0.10.0
libtpu: 0.0.40
codegen_flags: <defaults>
</compile_context>

<pallas_src>
import jax
import jax.numpy as jnp
from jax.experimental import pallas as pl
from jax.experimental.pallas import tpu as pltpu


def _round_up(x, m):
    return ((x + m - 1) // m) * m


def modelnet_transitions_kernel(s_ref, a_ref, w1s_ref, w1a_ref, w2_ref, w3_ref,
                                b_ref, o_ref):
    h0 = w1s_ref.shape[1]
    h1 = w2_ref.shape[1]
    dout = w3_ref.shape[1]

    # Layer 1 + ReLU: the torch.cat([state, action]) is fused away by splitting the
    # first matmul over the two inputs (weights are VMEM-resident, so the extra tiny
    # dot rides in the MXU slot for free).
    h = (jnp.dot(s_ref[...], w1s_ref[...], preferred_element_type=jnp.float32)
         + jnp.dot(a_ref[...], w1a_ref[...], preferred_element_type=jnp.float32)
         + b_ref[0:1, :h0])
    h = jnp.maximum(h, 0.0)

    # Layer 2 + ReLU
    h = jnp.dot(h, w2_ref[...], preferred_element_type=jnp.float32) + b_ref[1:2, :h1]
    h = jnp.maximum(h, 0.0)

    # Layer 3 (no activation). dout=3 -> masked store; vst is not the binding slot here.
    o_ref[...] = (jnp.dot(h, w3_ref[...], preferred_element_type=jnp.float32)
                  + b_ref[2:3, :dout]).astype(o_ref.dtype)


def modelnet_transitions_forward(state, action, params, *, max_tile_b=2048,
                                 min_grid_steps=2):
    """state: [B, ds], action: [B, da]. Returns [B, dout] (f32)."""
    state = state.astype(jnp.float32)
    action = action.astype(jnp.float32)
    B, ds = state.shape
    _, da = action.shape
    w1s, w1a = params["w1_s"], params["w1_a"]
    w2, w3, b_pack = params["w2"], params["w3"], params["b_pack"]
    h0, h1, dout = w1s.shape[1], w2.shape[1], w3.shape[1]
    assert w1s.shape[0] == ds and w1a.shape[0] == da

    # Batch tile selection:
    #  * as large as possible (cap 2048 rows) to amortize per-step grid overhead,
    #    while staying under v5e's 16 MiB scoped-VMEM default (128-lane padding
    #    inflates each row to ~2.5-3 KB across in/out/intermediate tiles);
    #  * at least `min_grid_steps` steps when B allows, so v7x's 2 TensorCores both
    #    get work via the "parallel" batch axis;
    #  * rows rounded to a multiple of 8 (sublane alignment); the ragged last block
    #    is safe because every op is row-independent and the writeback is masked.
    if B <= 8:
        tb = B
    else:
        tb = min(max_tile_b, max(8, _round_up(pl.cdiv(B, min_grid_steps), 8)))
    grid = (pl.cdiv(B, tb),)

    flops = 2 * B * (ds * h0 + da * h0 + h0 * h1 + h1 * dout)
    bytes_accessed = 4 * (B * (ds + da) + (ds + da) * h0 + h0 * h1 + h1 * dout
                          + b_pack.size + B * dout)

    return pl.pallas_call(
        modelnet_transitions_kernel,
        out_shape=jax.ShapeDtypeStruct((B, dout), jnp.float32),
        grid_spec=pltpu.PrefetchScalarGridSpec(
            num_scalar_prefetch=0,
            grid=grid,
            in_specs=[
                pl.BlockSpec((tb, ds), lambda i: (i, 0)),      # state: tiled over batch
                pl.BlockSpec((tb, da), lambda i: (i, 0)),      # action: tiled over batch
                pl.BlockSpec((ds, h0), lambda i: (0, 0)),      # weights: VMEM-resident
                pl.BlockSpec((da, h0), lambda i: (0, 0)),
                pl.BlockSpec((h0, h1), lambda i: (0, 0)),
                pl.BlockSpec((h1, dout), lambda i: (0, 0)),
                pl.BlockSpec(b_pack.shape, lambda i: (0, 0)),  # packed biases: resident
            ],
            out_specs=pl.BlockSpec((tb, dout), lambda i: (i, 0)),
        ),
        compiler_params=pltpu.CompilerParams(
            dimension_semantics=("parallel",),   # v7x: both TCs share the batch grid
        ),
        cost_estimate=pl.CostEstimate(
            flops=flops, transcendentals=0, bytes_accessed=bytes_accessed),
    )(state, action, w1s, w1a, w2, w3, b_pack)


def init_params(key, input_size_split, hidden_size, output_size):
    """PyTorch-style uniform(-1/sqrt(fan_in), 1/sqrt(fan_in)) init for all Linears.

    input_size_split = (state_dim, action_dim); W1 is stored pre-split so the kernel
    never needs the concatenated input.
    """
    ds, da = input_size_split
    dims = [ds + da, hidden_size[0], hidden_size[1], output_size]
    keys = jax.random.split(key, 6)
    params = {}
    for i in range(3):
        fan_in = dims[i]
        bound = 1.0 / (fan_in ** 0.5)
        params[f"w{i + 1}"] = jax.random.uniform(
            keys[2 * i], (dims[i], dims[i + 1]), jnp.float32, -bound, bound)
        params[f"b{i + 1}"] = jax.random.uniform(
            keys[2 * i + 1], (1, dims[i + 1]), jnp.float32, -bound, bound)

    # Pre-split W1 across the state/action rows (one-time; removes the in-graph concat).
    params["w1_s"] = params["w1"][:ds, :]
    params["w1_a"] = params["w1"][ds:, :]

    # Pack the three bias rows into one zero-padded [3, Fmax] slab (single DMA operand).
    fmax = max(dims[1], dims[2], dims[3])
    b_pack = jnp.zeros((3, fmax), jnp.float32)
    b_pack = b_pack.at[0, :dims[1]].set(params["b1"][0])
    b_pack = b_pack.at[1, :dims[2]].set(params["b2"][0])
    b_pack = b_pack.at[2, :dims[3]].set(params["b3"][0])
    params["b_pack"] = b_pack
    return params


def reference_forward(state, action, params):
    x = jnp.concatenate([state, action], axis=1)
    h = jnp.maximum(x @ params["w1"] + params["b1"], 0.0)
    h = jnp.maximum(h @ params["w2"] + params["b2"], 0.0)
    return h @ params["w3"] + params["b3"]


if __name__ == "__main__":
    # Pendulum-like shapes: state dim 3, action dim 1 -> input 4; hidden (32, 32);
    # output = next-state prediction (dim 3).
    state_dim, action_dim = 3, 1
    hidden_size = (32, 32)
    output_size = 3

    key = jax.random.PRNGKey(0)
    k_params, k_s1, k_a1, k_s2, k_a2 = jax.random.split(key, 5)
    params = init_params(k_params, (state_dim, action_dim), hidden_size, output_size)

    # Case 1: tiny batch (single grid step). Case 2: B=20 -> 2 grid steps with a
    # ragged last block, exercising the multi-step / masked-writeback path.
    for ks, ka, batch in ((k_s1, k_a1, 8), (k_s2, k_a2, 20)):
        state = jax.random.normal(ks, (batch, state_dim), jnp.float32)
        action = jax.random.normal(ka, (batch, action_dim), jnp.float32)

        out = jax.block_until_ready(modelnet_transitions_forward(state, action, params))
        ref = reference_forward(state, action, params)

        assert out.shape == (batch, output_size)
        # Tolerance 1e-4: default TPU matmul precision may use bf16 passes; kernel and
        # reference only differ in the (state|action) split of the first contraction.
        assert jnp.allclose(out, ref, atol=1e-4, rtol=1e-4), (
            f"mismatch at B={batch}: max err {jnp.max(jnp.abs(out - ref))}")

    print("KERNEL_OK")
</pallas_src>

<mosaic_0001>
module attributes {stable_mosaic.version = 11 : i64} {
  func.func @modelnet_transitions_kernel(%arg0: i32, %arg1: memref<8x3xf32, #tpu.memory_space<vmem>>, %arg2: memref<8x1xf32, #tpu.memory_space<vmem>>, %arg3: memref<3x32xf32, #tpu.memory_space<vmem>>, %arg4: memref<1x32xf32, #tpu.memory_space<vmem>>, %arg5: memref<32x32xf32, #tpu.memory_space<vmem>>, %arg6: memref<32x3xf32, #tpu.memory_space<vmem>>, %arg7: memref<3x32xf32, #tpu.memory_space<vmem>>, %arg8: memref<8x3xf32, #tpu.memory_space<vmem>>) attributes {dimension_semantics = [#tpu.dimension_semantics<parallel>], iteration_bounds = array<i64: 1>, scalar_prefetch = 0 : i64, scratch_operands = 0 : i64, tpu.core_type = #tpu.core_type<tc>, window_params = [{transform_indices = @transform_0, window_bounds = array<i64: 8, 3>}, {transform_indices = @transform_1, window_bounds = array<i64: 8, 1>}, {pipeline_mode = #tpu.pipeline_mode<synchronous>, transform_indices = @transform_2, window_bounds = array<i64: 3, 32>}, {pipeline_mode = #tpu.pipeline_mode<synchronous>, transform_indices = @transform_3, window_bounds = array<i64: 1, 32>}, {pipeline_mode = #tpu.pipeline_mode<synchronous>, transform_indices = @transform_4, window_bounds = array<i64: 32, 32>}, {pipeline_mode = #tpu.pipeline_mode<synchronous>, transform_indices = @transform_5, window_bounds = array<i64: 32, 3>}, {pipeline_mode = #tpu.pipeline_mode<synchronous>, transform_indices = @transform_6, window_bounds = array<i64: 3, 32>}, {transform_indices = @transform_7, window_bounds = array<i64: 8, 3>}]} {
    %c0 = arith.constant 0 : index
    %c0_0 = arith.constant 0 : index
    %0 = vector.load %arg1[%c0, %c0_0] : memref<8x3xf32, #tpu.memory_space<vmem>>, vector<8x3xf32>
    %c0_1 = arith.constant 0 : index
    %c0_2 = arith.constant 0 : index
    %1 = vector.load %arg3[%c0_1, %c0_2] : memref<3x32xf32, #tpu.memory_space<vmem>>, vector<3x32xf32>
    %cst = arith.constant dense<0.000000e+00> : vector<8x32xf32>
    %2 = tpu.matmul %0, %1, %cst {dimension_numbers = #tpu.dot_dimension_numbers<[1], [0], [0], [1], [0, 0, 1, 1], [], []>} : vector<8x3xf32>, vector<3x32xf32>, vector<8x32xf32> -> vector<8x32xf32>
    %c0_3 = arith.constant 0 : index
    %c0_4 = arith.constant 0 : index
    %3 = vector.load %arg2[%c0_3, %c0_4] : memref<8x1xf32, #tpu.memory_space<vmem>>, vector<8x1xf32>
    %c0_5 = arith.constant 0 : index
    %c0_6 = arith.constant 0 : index
    %4 = vector.load %arg4[%c0_5, %c0_6] : memref<1x32xf32, #tpu.memory_space<vmem>>, vector<1x32xf32>
    %cst_7 = arith.constant dense<0.000000e+00> : vector<8x32xf32>
    %5 = tpu.matmul %3, %4, %cst_7 {dimension_numbers = #tpu.dot_dimension_numbers<[1], [0], [0], [1], [0, 0, 1, 1], [], []>} : vector<8x1xf32>, vector<1x32xf32>, vector<8x32xf32> -> vector<8x32xf32>
    %6 = arith.addf %2, %5 : vector<8x32xf32>
    %c0_8 = arith.constant 0 : index
    %c0_9 = arith.constant 0 : index
    %7 = vector.load %arg7[%c0_8, %c0_9] : memref<3x32xf32, #tpu.memory_space<vmem>>, vector<1x32xf32>
    %8 = vector.broadcast %7 : vector<1x32xf32> to vector<8x32xf32>
    %9 = arith.addf %6, %8 : vector<8x32xf32>
    %cst_10 = arith.constant 0.000000e+00 : f32
    %10 = vector.broadcast %cst_10 : f32 to vector<8x32xf32>
    %11 = arith.maximumf %9, %10 : vector<8x32xf32>
    %c0_11 = arith.constant 0 : index
    %c0_12 = arith.constant 0 : index
    %12 = vector.load %arg5[%c0_11, %c0_12] : memref<32x32xf32, #tpu.memory_space<vmem>>, vector<32x32xf32>
    %cst_13 = arith.constant dense<0.000000e+00> : vector<8x32xf32>
    %13 = tpu.matmul %11, %12, %cst_13 {dimension_numbers = #tpu.dot_dimension_numbers<[1], [0], [0], [1], [0, 0, 1, 1], [], []>} : vector<8x32xf32>, vector<32x32xf32>, vector<8x32xf32> -> vector<8x32xf32>
    %c1 = arith.constant 1 : index
    %c0_14 = arith.constant 0 : index
    %14 = vector.load %arg7[%c1, %c0_14] : memref<3x32xf32, #tpu.memory_space<vmem>>, vector<1x32xf32>
    %15 = vector.broadcast %14 : vector<1x32xf32> to vector<8x32xf32>
    %16 = arith.addf %13, %15 : vector<8x32xf32>
    %cst_15 = arith.constant 0.000000e+00 : f32
    %17 = vector.broadcast %cst_15 : f32 to vector<8x32xf32>
    %18 = arith.maximumf %16, %17 : vector<8x32xf32>
    %c0_16 = arith.constant 0 : index
    %c0_17 = arith.constant 0 : index
    %19 = vector.load %arg6[%c0_16, %c0_17] : memref<32x3xf32, #tpu.memory_space<vmem>>, vector<32x3xf32>
    %cst_18 = arith.constant dense<0.000000e+00> : vector<8x3xf32>
    %20 = tpu.matmul %18, %19, %cst_18 {dimension_numbers = #tpu.dot_dimension_numbers<[1], [0], [0], [1], [0, 0, 1, 1], [], []>} : vector<8x32xf32>, vector<32x3xf32>, vector<8x3xf32> -> vector<8x3xf32>
    %c2 = arith.constant 2 : index
    %c0_19 = arith.constant 0 : index
    %21 = vector.load %arg7[%c2, %c0_19] : memref<3x32xf32, #tpu.memory_space<vmem>>, vector<1x3xf32>
    %22 = vector.broadcast %21 : vector<1x3xf32> to vector<8x3xf32>
    %23 = arith.addf %20, %22 : vector<8x3xf32>
    %c0_20 = arith.constant 0 : index
    %c0_21 = arith.constant 0 : index
    %24 = vector.load %arg8[%c0_20, %c0_21] : memref<8x3xf32, #tpu.memory_space<vmem>>, vector<8x3xf32>
    tpu.vector_store %arg8[%c0_20, %c0_21], %23 {strides = array<i32>} : memref<8x3xf32, #tpu.memory_space<vmem>>, vector<8x3xf32>,
    return
  }
  func.func @transform_0(%arg0: i32) -> (i32, i32) {
    %c0_i32 = arith.constant 0 : i32
    %c0_i32_0 = arith.constant 0 : i32
    return %arg0, %c0_i32 : i32, i32
  }
  func.func @transform_1(%arg0: i32) -> (i32, i32) {
    %c0_i32 = arith.constant 0 : i32
    %c0_i32_0 = arith.constant 0 : i32
    return %arg0, %c0_i32 : i32, i32
  }
  func.func @transform_2(%arg0: i32) -> (i32, i32) {
    %c0_i32 = arith.constant 0 : i32
    %c0_i32_0 = arith.constant 0 : i32
    %c0_i32_1 = arith.constant 0 : i32
    return %c0_i32, %c0_i32_0 : i32, i32
  }
  func.func @transform_3(%arg0: i32) -> (i32, i32) {
    %c0_i32 = arith.constant 0 : i32
    %c0_i32_0 = arith.constant 0 : i32
    %c0_i32_1 = arith.constant 0 : i32
    return %c0_i32, %c0_i32_0 : i32, i32
  }
  func.func @transform_4(%arg0: i32) -> (i32, i32) {
    %c0_i32 = arith.constant 0 : i32
    %c0_i32_0 = arith.constant 0 : i32
    %c0_i32_1 = arith.constant 0 : i32
    return %c0_i32, %c0_i32_0 : i32, i32
  }
  func.func @transform_5(%arg0: i32) -> (i32, i32) {
    %c0_i32 = arith.constant 0 : i32
    %c0_i32_0 = arith.constant 0 : i32
    %c0_i32_1 = arith.constant 0 : i32
    return %c0_i32, %c0_i32_0 : i32, i32
  }
  func.func @transform_6(%arg0: i32) -> (i32, i32) {
    %c0_i32 = arith.constant 0 : i32
    %c0_i32_0 = arith.constant 0 : i32
    %c0_i32_1 = arith.constant 0 : i32
    return %c0_i32, %c0_i32_0 : i32, i32
  }
  func.func @transform_7(%arg0: i32) -> (i32, i32) {
    %c0_i32 = arith.constant 0 : i32
    %c0_i32_0 = arith.constant 0 : i32
    return %arg0, %c0_i32 : i32, i32
  }
}

</mosaic_0001>

<bundles_post_ra>
// kernel: tpu_custom_call.1
= control target key start
LH: loop header
LB: loop body
LE: loop exit
PB: predicated region body
PF: predicated region fallthrough
CT: control target
= control target key end

     0   :  { %vm34_vm0 = vcmask 1040384   ;;  %vm112_vm1 = vcmask 1042432   ;;  %v434_v0 = vmov 0.0   ;;  %vm30_vm2 = vcmask 7168   ;;  %s527_s3 = inlined_call_operand.vmem [shape: f32[1,32], index: 3, kind: input, shape index: {}]   ;;  %s528_s2 = inlined_call_operand.vmem [shape: f32[3,32], index: 2, kind: input, shape index: {}]   ;;  %s529_s1 = inlined_call_operand.vmem [shape: f32[8,1], index: 1, kind: input, shape index: {}]   ;;  %s530_s0 = inlined_call_operand.vmem [shape: f32[8,3], index: 0, kind: input, shape index: {}]   ;;  %s531_s4 = inlined_call_operand.vmem [shape: f32[32,32], index: 4, kind: input, shape index: {}]   ;;  %s532_s5 = inlined_call_operand.vmem [shape: f32[32,3], index: 5, kind: input, shape index: {}]   ;;  %s533_s6 = inlined_call_operand.vmem [shape: f32[3,32], index: 6, kind: input, shape index: {}]   ;;  %s534_s7 = inlined_call_operand.vmem [shape: f32[8,3], index: 7, kind: output, shape index: {}]  }
   0x1   :  { %387 = vmatprep.subr.mxu0 %v434_v0  ;;  %392 = vmatprep.subr.mxu1 %v434_v0  ;;  %v29_v1 = vld [vmem:[%s527_s3] sm:$0x1]  ;;  %vm435_vm3 = vmmov 0   ;;  %vm108_vm4 = vcmask 23552   ;;  %v436_v5 = vmov 0.0|0.0   ;;  %v194_v7 = vld [vmem:[%s531_s4 + $0x8] sm:$0xff] }
   0x2   :  { %v27_v2 = vld [vmem:[%s528_s2] sm:$0x7]  ;;  %388 = vmatpush3.msk.msra.mxu0 %vm34_vm0, %v29_v1  ;;  %389 = vmatprep.mubr.msk.f32.mxu0 %vm435_vm3, %v434_v0  ;;  %v195_v9 = vld [vmem:[%s531_s4 + $0x10] sm:$0xff]  ;;  %v196_v10 = vld [vmem:[%s531_s4 + $0x18] sm:$0xff]  ;;  %vm202_vm5 = vcmask 261120  }
   0x3   :  { %v28_v3 = vld [vmem:[%s529_s1] sm:$0xff]  ;;  %393 = vmatpush3.msk.msra.mxu1 %vm112_vm1, %v27_v2  ;;  %394 = vmatprep.mubr.msk.f32.mxu1 %vm435_vm3, %v434_v0  ;;  %v423_v11 = vpack.c.bf16 %v196_v10, %v195_v9  ;;  %v278_v13 = vld [vmem:[%s532_s5 + $0x8] sm:$0xff]  ;;  %v279_v23 = vld [vmem:[%s532_s5 + $0x10] sm:$0xff] }
   0x4   :  { %v26_v4 = vld [vmem:[%s530_s0] sm:$0xff]  ;;  %390 = vmatmul.mubr.msk.f32.vlgmr.msra.gmra.mrb[0].mxu0 %vm30_vm2, %v28_v3  ;;  %419 = vmatprep.subr.bf16.mxu0 %v436_v5  ;;  %v280_v24 = vld [vmem:[%s532_s5 + $0x18] sm:$0xff] }
   0x5   :  { %395 = vmatmul.mubr.msk.f32.vlgmr.msra.gmra.mrb[0].mxu1 %vm108_vm4, %v26_v4  ;;  %405 = vmatprep.mubr.msk.f32.mxu0 %vm435_vm3, %v434_v0  ;;  %v193_v6 = vld [vmem:[%s531_s4] sm:$0xff]  ;;  %v429_v25 = vpack.c.bf16 %v280_v24, %v279_v23 }
   0x6   :  { %425 = vmatprep.subr.bf16.mxu1 %v436_v5  ;;  %416 = vmatprep.mubr.msk.f32.mxu1 %vm435_vm3, %v434_v0  ;;  %v420_v8 = vpack.c.bf16 %v194_v7, %v193_v6  ;;  %v277_v12 = vld [vmem:[%s532_s5] sm:$0xff] }
   0x7   :  { %v426_v14 = vpack.c.bf16 %v278_v13, %v277_v12  ;;  %v368_v17 = vld [vmem:[%s533_s6] ss:$0 sm:$0xff]  ;;  %v369_v26 = vld [vmem:[%s533_s6 + $0x1] ss:$0 sm:$0xff]  ;;  %v371_v31 = vld [vmem:[%s533_s6 + $0x2] ss:$0 sm:$0xff] }
   0x8   :  { %421 = vmatpush3.bf16.msra.mxu0 %v420_v8 }
   0x9   :  { %422 = vmatprep.subr.bf16.mxu0 %v436_v5  ;;  %427 = vmatpush3.bf16.msra.mxu1 %v426_v14 }
   0xa   :  { %428 = vmatprep.subr.bf16.mxu1 %v436_v5 }
   0xc   :  { %424 = vmatpush3.bf16.msra.mxu0 %v423_v11 }
   0xd   :  { %430 = vmatpush3.bf16.msra.mxu1 %v429_v25 }
  0xd7   :  { %v104_v15 = vpop.f32.mrb[0].mxu0 }
  0xd8   :  { %v182_v16 = vpop.f32.mrb[0].mxu1  ;;  %v391_v19 = vpop.f32.mrb[1].mxu0 }
  0xd9   :  { %v183_v18 = vadd.f32 %v182_v16, %v104_v15  ;;  %v396_v20 = vpop.f32.mrb[1].mxu1 }
  0xdb   :  { %v191_v21 = vadd.f32 %v368_v17, %v183_v18 }
  0xdd   :  { %v192_v22 = vmax.f32 %v191_v21, 0.0 }
  0xdf   :  { %406 = vmatmul.mubr.msk.f32.vlgmr.msra.gmra.mrb[2].mxu0 %vm202_vm5, %v192_v22 }
 0x1b2   :  { %v272_v27 = vpop.f32.mrb[2].mxu0 }
 0x1b3   :  { %v273_v28 = vadd.f32 %v369_v26, %v272_v27  ;;  %v407_v29 = vpop.f32.mrb[3].mxu0 }
 0x1b5   :  { %v276_v30 = vmax.f32 %v273_v28, 0.0 }
 0x1b7   :  { %417 = vmatmul.mubr.msk.f32.vlgmr.msra.gmra.mrb[2].mxu1 %vm202_vm5, %v276_v30 }
 0x28a   :  { %v355_v32 = vpop.f32.mrb[2].mxu1 }
 0x28b   :  { %v356_v33 = vadd.f32 %v371_v31, %v355_v32  ;;  %v418_v34 = vpop.f32.mrb[3].mxu1 }
 0x28d   :  { %359 = vst.msk [vmem:[%s534_s7] sm:$0xff] %vm108_vm4, %v356_v33 }

</bundles_post_ra>
